<compile_context>
chip_gen: v7x
topology: tpu7x:2x2x1
jax: 0.10.0
libtpu: 0.0.40
codegen_flags: <defaults>
</compile_context>

<pallas_src>
import functools

import jax
import jax.numpy as jnp
from jax.experimental import pallas as pl
from jax.experimental.pallas import tpu as pltpu

PIXEL_MEAN = (0.48145466, 0.4578275, 0.40821073)
PIXEL_STD = (0.26862954, 0.26130258, 0.27577711)
MASK_THR = 0.5
TEMPERATURE = 100.0
EPS = 1e-12
TXT_PAD = 128  # pad text rows to one full lane width -> unmasked logits vst


# ------------------------------------------------------------------
# kernel 1: fused mask-threshold + region fill (mask_fill == 'mean')
#   grid iterates over K-tiles of mask proposals (parallel).
#   Emits: flat lane-dense f32 regions (module output), a bf16 copy for the
#   encoder, and a lane-padded per-mask foreground pixel count.
# ------------------------------------------------------------------
def make_regions(image_flat, mask_flat):
    C, HW = image_flat.shape
    K = mask_flat.shape[0]
    P = C * HW
    # Block the K axis: amortizes ~0.35us/step overhead and fills sublanes.
    # TODO(synk): on v7x choose TK so K/TK is an even number >= 2 so both
    # TensorCores take half the proposals.
    TK = 8 if K % 8 == 0 else K

    def region_kernel(img_ref, mask_ref, unnorm_ref, reg_ref, cnt_ref):
        # img_ref:    (C, HW)      whole image, resident across the grid
        # mask_ref:   (TK, HW)     soft masks for this K-tile
        # unnorm_ref: (TK, C*HW)   f32 masked regions (module output)
        # reg_ref:    (TK, C*HW)   bf16 masked regions (encoder input)
        # cnt_ref:    (TK, 128)    foreground pixel counts, lane-padded
        m = (mask_ref[...] > MASK_THR).astype(jnp.float32)        # (TK, HW)
        cnt_ref[...] = jnp.broadcast_to(
            jnp.sum(m, axis=1, keepdims=True), (TK, 128))
        # static channel loop -> flat lane-dense stores, 128-aligned slices
        for c in range(C):
            fill_c = 255.0 * PIXEL_MEAN[c]      # python float (not captured)
            img_c = img_ref[c:c + 1, :]         # (1, HW) broadcasts over TK
            reg_c = img_c * m + fill_c * (1.0 - m)
            unnorm_ref[:, c * HW:(c + 1) * HW] = reg_c
            reg_ref[:, c * HW:(c + 1) * HW] = reg_c.astype(jnp.bfloat16)

    return pl.pallas_call(
        region_kernel,
        grid=(K // TK,),
        in_specs=[pl.BlockSpec((C, HW), lambda k: (0, 0)),
                  pl.BlockSpec((TK, HW), lambda k: (k, 0))],
        out_specs=(pl.BlockSpec((TK, P), lambda k: (k, 0)),
                   pl.BlockSpec((TK, P), lambda k: (k, 0)),
                   pl.BlockSpec((TK, 128), lambda k: (k, 0))),
        out_shape=(jax.ShapeDtypeStruct((K, P), jnp.float32),
                   jax.ShapeDtypeStruct((K, P), jnp.bfloat16),
                   jax.ShapeDtypeStruct((K, 128), jnp.float32)),
        compiler_params=pltpu.CompilerParams(
            dimension_semantics=("parallel",)),
    )(image_flat, mask_flat)


# ------------------------------------------------------------------
# kernel 2: fused visual projection (tiled K-reduction over P) + image
#           feature L2 norm + similarity logits (text is pre-normalized).
#   grid = (K tiles [parallel] -- single tile so w_eff streams exactly once,
#           P tiles [arbitrary/reduction]).
# ------------------------------------------------------------------
def encode_sim_kernel(reg_ref, w_ref, b_ref, txt_ref, logits_ref, acc_ref):
    j = pl.program_id(1)

    @pl.when(j == 0)
    def _():
        acc_ref[...] = jnp.zeros_like(acc_ref)

    # bf16 MXU operands (regions already bf16 from kernel 1), f32 accumulation
    acc_ref[...] += jnp.dot(reg_ref[...], w_ref[...],
                            preferred_element_type=jnp.float32)

    @pl.when(j == pl.num_programs(1) - 1)
    def _():
        y = acc_ref[...] + b_ref[...]                               # (tm, D)
        img = y * jax.lax.rsqrt(
            jnp.sum(y * y, axis=-1, keepdims=True) + EPS)
        # text is pre-normalized + lane-padded; contract last dims directly
        logits_ref[...] = TEMPERATURE * jax.lax.dot_general(
            img.astype(jnp.bfloat16), txt_ref[...],
            dimension_numbers=(((1,), (1,)), ((), ())),
            preferred_element_type=jnp.float32)


def _largest_aligned_divisor(p, target=2048):
    """Largest multiple of 128 dividing p and <= target."""
    best, t = None, 128
    while t <= min(p, target):
        if p % t == 0:
            best = t
        t += 128
    if best is None:
        raise ValueError(
            f"P={p} has no 128-aligned divisor <= {target}; pad P to a "
            f"multiple of 128 before calling encode_and_sim.")
    return best


def encode_and_sim(regions_bf16, w_eff, b_eff, txt_pad):
    K, P = regions_bf16.shape
    D = w_eff.shape[1]
    NT = txt_pad.shape[0]
    tm = K                        # all proposals in one MXU row tile:
    tk = _largest_aligned_divisor(P)   # -> w_eff is streamed exactly once
    # TODO(synk): at real CLIP scale (K~100, P=150528, D=512) pad K up to the
    # MXU row count (128 v5e / 256 v6e,v7x) to keep a single K tile; on v6e
    # add pipeline_mode=pl.Buffered(3) on the w_eff spec; on v7x split D
    # across the two TensorCores (second parallel axis) and cap VMEM <=48MB.
    return pl.pallas_call(
        encode_sim_kernel,
        grid=(pl.cdiv(K, tm), P // tk),
        in_specs=[pl.BlockSpec((tm, tk), lambda i, j: (i, j)),
                  pl.BlockSpec((tk, D), lambda i, j: (j, 0)),
                  pl.BlockSpec((1, D), lambda i, j: (0, 0)),
                  pl.BlockSpec((NT, D), lambda i, j: (0, 0))],
        out_specs=pl.BlockSpec((tm, NT), lambda i, j: (i, 0)),
        out_shape=jax.ShapeDtypeStruct((K, NT), jnp.float32),
        scratch_shapes=[pltpu.VMEM((tm, D), jnp.float32)],
        compiler_params=pltpu.CompilerParams(
            dimension_semantics=("parallel", "arbitrary"),
            vmem_limit_bytes=32 * 1024 * 1024),
    )(regions_bf16, w_eff, b_eff, txt_pad)


# ------------------------------------------------------------------
# one-time parameter prep (model init; NOT in the per-call jit path):
#   fold (x - 255*mean)/(255*std) into the visual projection, pre-normalize
#   text features, and pad them to a full lane width.
# ------------------------------------------------------------------
def prepare_params(params, C, HW):
    D = params["w_visual"].shape[1]
    mean = jnp.asarray(PIXEL_MEAN, jnp.float32) * 255.0            # (3,)
    std = jnp.asarray(PIXEL_STD, jnp.float32) * 255.0              # (3,)
    w3 = params["w_visual"].reshape(C, HW, D)                      # (C,HW,D)
    w_eff = (w3 / std[:, None, None]).reshape(C * HW, D).astype(jnp.bfloat16)
    b_eff = -jnp.einsum("c,cpd->d", mean / std, w3)[None, :]       # (1,D) f32

    txt = jnp.concatenate([params["text_features"],
                           params["non_object_embedding"]], axis=0)
    txt = txt * jax.lax.rsqrt(jnp.sum(txt * txt, -1, keepdims=True) + EPS)
    nt = txt.shape[0]
    txt_pad = jnp.zeros((TXT_PAD, D), jnp.float32).at[:nt].set(txt)
    return {"w_eff": w_eff, "b_eff": b_eff,
            "txt_pad": txt_pad.astype(jnp.bfloat16)}


# ------------------------------------------------------------------
# forward: mirrors MaskFormerClipAdapter.forward(image, text, mask)
# ------------------------------------------------------------------
@functools.partial(jax.jit, static_argnames=("num_text",))
def maskformer_clip_adapter_forward(image, mask, prep, *, num_text):
    C, H, W = image.shape
    K = mask.shape[0]
    HW = H * W

    image_flat = image.reshape(C, HW)
    mask_flat = mask.reshape(K, HW)

    # _preprocess_image: threshold, fill outside mask with 255*mean, validity
    unnorm_flat, reg_bf16, counts = make_regions(image_flat, mask_flat)
    valid = counts[:, 0] > 0.0
    # TODO(synk): reference drops invalid masks (dynamic shape), crops each
    # region to its bbox and bicubic-resizes to 224x224 before CLIP; here all
    # K regions are kept at full resolution and flagged via `valid`.

    # get_image_features + get_sim_logits, fused (synthetic linear visual
    # tower; pixel normalization folded into w_eff/b_eff at init time).
    logits_pad = encode_and_sim(reg_bf16, prep["w_eff"], prep["b_eff"],
                                prep["txt_pad"])
    logits = logits_pad[:, :num_text]

    unnorm_regions = unnorm_flat.reshape(K, C, H, W)
    return logits, unnorm_regions, valid


if __name__ == "__main__":
    key = jax.random.PRNGKey(0)
    k_img, k_mask, k_txt, k_noe, k_w = jax.random.split(key, 5)

    C, H, W = 3, 16, 16   # image [C, H, W]
    K = 4                 # number of mask proposals
    N = 8                 # number of text classes
    D = 32                # synthetic CLIP embedding dim

    image = jax.random.uniform(k_img, (C, H, W), jnp.float32) * 255.0
    mask = jax.random.uniform(k_mask, (K, H, W), jnp.float32)

    params = {
        # TODO(synk): real module uses frozen pretrained CLIP (ViT-B/16)
        # visual & text towers; replaced by a deterministic random linear
        # projection and random text features.
        "w_visual": jax.random.normal(k_w, (C * H * W, D), jnp.float32)
                    * (C * H * W) ** -0.5,
        "text_features": jax.random.normal(k_txt, (N, D), jnp.float32),
        "non_object_embedding": jax.random.normal(k_noe, (1, D), jnp.float32)
                                * 512.0 ** -0.5,
    }

    # one-time prep, hoisted out of the jitted per-call path
    prep = prepare_params(params, C, H * W)
    NT = N + 1

    logits, unnorm_regions, valid = maskformer_clip_adapter_forward(
        image, mask, prep, num_text=NT)
    jax.block_until_ready((logits, unnorm_regions, valid))

    # shape + sanity checks
    assert logits.shape == (K, NT)
    assert unnorm_regions.shape == (K, C, H, W)
    assert valid.shape == (K,)
    assert bool(jnp.all(jnp.isfinite(logits)))

    # exact-path checks (mask fill + validity are pure f32 math)
    binm = (mask > MASK_THR).astype(jnp.float32)
    fill = jnp.asarray(PIXEL_MEAN, jnp.float32) * 255.0
    ref_unnorm = (image[None] * binm[:, None]
                  + fill[None, :, None, None] * (1.0 - binm[:, None]))
    assert bool(jnp.allclose(unnorm_regions, ref_unnorm, atol=1e-2))
    assert bool(jnp.array_equal(valid, jnp.any(mask > MASK_THR, axis=(1, 2))))

    # loose numerical check of the fused bf16 projection+norm+sim vs f32 ref
    mean4 = jnp.asarray(PIXEL_MEAN, jnp.float32).reshape(1, 3, 1, 1) * 255.0
    std4 = jnp.asarray(PIXEL_STD, jnp.float32).reshape(1, 3, 1, 1) * 255.0
    feat = ((ref_unnorm - mean4) / std4).reshape(K, -1) @ params["w_visual"]
    feat = feat / jnp.linalg.norm(feat, axis=-1, keepdims=True)
    txt = jnp.concatenate([params["text_features"],
                           params["non_object_embedding"]], axis=0)
    txt = txt / jnp.linalg.norm(txt, axis=-1, keepdims=True)
    ref_logits = TEMPERATURE * feat @ txt.T
    rel_err = jnp.max(jnp.abs(logits - ref_logits)) / (
        jnp.max(jnp.abs(ref_logits)) + 1e-6)
    assert float(rel_err) < 0.05, f"rel_err={float(rel_err)}"

    print("KERNEL_OK")
</pallas_src>

<mosaic_0001>
module attributes {stable_mosaic.version = 11 : i64} {
  func.func @region_kernel(%arg0: i32, %arg1: memref<3x256xf32, #tpu.memory_space<vmem>>, %arg2: memref<4x256xf32, #tpu.memory_space<vmem>>, %arg3: memref<4x768xf32, #tpu.memory_space<vmem>>, %arg4: memref<4x768xbf16, #tpu.memory_space<vmem>>, %arg5: memref<4x128xf32, #tpu.memory_space<vmem>>) attributes {dimension_semantics = [#tpu.dimension_semantics<parallel>], iteration_bounds = array<i64: 1>, scalar_prefetch = 0 : i64, scratch_operands = 0 : i64, tpu.core_type = #tpu.core_type<tc>, window_params = [{pipeline_mode = #tpu.pipeline_mode<synchronous>, transform_indices = @transform_0, window_bounds = array<i64: 3, 256>}, {transform_indices = @transform_1, window_bounds = array<i64: 4, 256>}, {transform_indices = @transform_2, window_bounds = array<i64: 4, 768>}, {transform_indices = @transform_3, window_bounds = array<i64: 4, 768>}, {transform_indices = @transform_4, window_bounds = array<i64: 4, 128>}]} {
    %c0 = arith.constant 0 : index
    %c0_0 = arith.constant 0 : index
    %0 = vector.load %arg2[%c0, %c0_0] : memref<4x256xf32, #tpu.memory_space<vmem>>, vector<4x256xf32>
    %cst = arith.constant 5.000000e-01 : f32
    %1 = vector.broadcast %cst : f32 to vector<4x256xf32>
    %2 = arith.cmpf ogt, %0, %1 : vector<4x256xf32>
    %3 = arith.extui %2 : vector<4x256xi1> to vector<4x256xi32>
    %4 = arith.sitofp %3 : vector<4x256xi32> to vector<4x256xf32>
    %cst_1 = arith.constant dense<0.000000e+00> : vector<4xf32>
    %5 = vector.multi_reduction <add>, %4, %cst_1 [1] : vector<4x256xf32> to vector<4xf32>
    %6 = vector.shape_cast %5 : vector<4xf32> to vector<4x1xf32>
    %7 = vector.shape_cast %6 : vector<4x1xf32> to vector<4x1xf32>
    %8 = vector.broadcast %7 : vector<4x1xf32> to vector<4x128xf32>
    %c0_2 = arith.constant 0 : index
    %c0_3 = arith.constant 0 : index
    %9 = vector.load %arg5[%c0_2, %c0_3] : memref<4x128xf32, #tpu.memory_space<vmem>>, vector<4x128xf32>
    tpu.vector_store %arg5[%c0_2, %c0_3], %8 {strides = array<i32>} : memref<4x128xf32, #tpu.memory_space<vmem>>, vector<4x128xf32>,
    %c0_4 = arith.constant 0 : index
    %c0_5 = arith.constant 0 : index
    %10 = vector.load %arg1[%c0_4, %c0_5] : memref<3x256xf32, #tpu.memory_space<vmem>>, vector<1x256xf32>
    %11 = vector.broadcast %10 : vector<1x256xf32> to vector<4x256xf32>
    %12 = arith.mulf %11, %4 : vector<4x256xf32>
    %cst_6 = arith.constant 1.000000e+00 : f32
    %13 = vector.broadcast %cst_6 : f32 to vector<4x256xf32>
    %14 = arith.subf %13, %4 : vector<4x256xf32>
    %cst_7 = arith.constant 122.770935 : f32
    %15 = vector.broadcast %cst_7 : f32 to vector<4x256xf32>
    %16 = arith.mulf %15, %14 : vector<4x256xf32>
    %17 = arith.addf %12, %16 : vector<4x256xf32>
    %c0_8 = arith.constant 0 : index
    %c0_9 = arith.constant 0 : index
    %18 = vector.load %arg3[%c0_8, %c0_9] : memref<4x768xf32, #tpu.memory_space<vmem>>, vector<4x256xf32>
    tpu.vector_store %arg3[%c0_8, %c0_9], %17 {strides = array<i32>} : memref<4x768xf32, #tpu.memory_space<vmem>>, vector<4x256xf32>,
    %19 = arith.truncf %17 : vector<4x256xf32> to vector<4x256xbf16>
    %c0_10 = arith.constant 0 : index
    %c0_11 = arith.constant 0 : index
    %20 = vector.load %arg4[%c0_10, %c0_11] : memref<4x768xbf16, #tpu.memory_space<vmem>>, vector<4x256xbf16>
    tpu.vector_store %arg4[%c0_10, %c0_11], %19 {strides = array<i32>} : memref<4x768xbf16, #tpu.memory_space<vmem>>, vector<4x256xbf16>,
    %c1 = arith.constant 1 : index
    %c0_12 = arith.constant 0 : index
    %21 = vector.load %arg1[%c1, %c0_12] : memref<3x256xf32, #tpu.memory_space<vmem>>, vector<1x256xf32>
    %22 = vector.broadcast %21 : vector<1x256xf32> to vector<4x256xf32>
    %23 = arith.mulf %22, %4 : vector<4x256xf32>
    %cst_13 = arith.constant 1.000000e+00 : f32
    %24 = vector.broadcast %cst_13 : f32 to vector<4x256xf32>
    %25 = arith.subf %24, %4 : vector<4x256xf32>
    %cst_14 = arith.constant 116.74601 : f32
    %26 = vector.broadcast %cst_14 : f32 to vector<4x256xf32>
    %27 = arith.mulf %26, %25 : vector<4x256xf32>
    %28 = arith.addf %23, %27 : vector<4x256xf32>
    %c0_15 = arith.constant 0 : index
    %c256 = arith.constant 256 : index
    %29 = vector.load %arg3[%c0_15, %c256] : memref<4x768xf32, #tpu.memory_space<vmem>>, vector<4x256xf32>
    tpu.vector_store %arg3[%c0_15, %c256], %28 {strides = array<i32>} : memref<4x768xf32, #tpu.memory_space<vmem>>, vector<4x256xf32>,
    %30 = arith.truncf %28 : vector<4x256xf32> to vector<4x256xbf16>
    %c0_16 = arith.constant 0 : index
    %c256_17 = arith.constant 256 : index
    %31 = vector.load %arg4[%c0_16, %c256_17] : memref<4x768xbf16, #tpu.memory_space<vmem>>, vector<4x256xbf16>
    tpu.vector_store %arg4[%c0_16, %c256_17], %30 {strides = array<i32>} : memref<4x768xbf16, #tpu.memory_space<vmem>>, vector<4x256xbf16>,
    %c2 = arith.constant 2 : index
    %c0_18 = arith.constant 0 : index
    %32 = vector.load %arg1[%c2, %c0_18] : memref<3x256xf32, #tpu.memory_space<vmem>>, vector<1x256xf32>
    %33 = vector.broadcast %32 : vector<1x256xf32> to vector<4x256xf32>
    %34 = arith.mulf %33, %4 : vector<4x256xf32>
    %cst_19 = arith.constant 1.000000e+00 : f32
    %35 = vector.broadcast %cst_19 : f32 to vector<4x256xf32>
    %36 = arith.subf %35, %4 : vector<4x256xf32>
    %cst_20 = arith.constant 104.093735 : f32
    %37 = vector.broadcast %cst_20 : f32 to vector<4x256xf32>
    %38 = arith.mulf %37, %36 : vector<4x256xf32>
    %39 = arith.addf %34, %38 : vector<4x256xf32>
    %c0_21 = arith.constant 0 : index
    %c512 = arith.constant 512 : index
    %40 = vector.load %arg3[%c0_21, %c512] : memref<4x768xf32, #tpu.memory_space<vmem>>, vector<4x256xf32>
    tpu.vector_store %arg3[%c0_21, %c512], %39 {strides = array<i32>} : memref<4x768xf32, #tpu.memory_space<vmem>>, vector<4x256xf32>,
    %41 = arith.truncf %39 : vector<4x256xf32> to vector<4x256xbf16>
    %c0_22 = arith.constant 0 : index
    %c512_23 = arith.constant 512 : index
    %42 = vector.load %arg4[%c0_22, %c512_23] : memref<4x768xbf16, #tpu.memory_space<vmem>>, vector<4x256xbf16>
    tpu.vector_store %arg4[%c0_22, %c512_23], %41 {strides = array<i32>} : memref<4x768xbf16, #tpu.memory_space<vmem>>, vector<4x256xbf16>,
    return
  }
  func.func @transform_0(%arg0: i32) -> (i32, i32) {
    %c0_i32 = arith.constant 0 : i32
    %c0_i32_0 = arith.constant 0 : i32
    %c0_i32_1 = arith.constant 0 : i32
    return %c0_i32, %c0_i32_0 : i32, i32
  }
  func.func @transform_1(%arg0: i32) -> (i32, i32) {
    %c0_i32 = arith.constant 0 : i32
    %c0_i32_0 = arith.constant 0 : i32
    return %arg0, %c0_i32 : i32, i32
  }
  func.func @transform_2(%arg0: i32) -> (i32, i32) {
    %c0_i32 = arith.constant 0 : i32
    %c0_i32_0 = arith.constant 0 : i32
    return %arg0, %c0_i32 : i32, i32
  }
  func.func @transform_3(%arg0: i32) -> (i32, i32) {
    %c0_i32 = arith.constant 0 : i32
    %c0_i32_0 = arith.constant 0 : i32
    return %arg0, %c0_i32 : i32, i32
  }
  func.func @transform_4(%arg0: i32) -> (i32, i32) {
    %c0_i32 = arith.constant 0 : i32
    %c0_i32_0 = arith.constant 0 : i32
    return %arg0, %c0_i32 : i32, i32
  }
}

module attributes {stable_mosaic.version = 11 : i64} {
  func.func @encode_sim_kernel(%arg0: i32, %arg1: i32, %arg2: memref<4x768xbf16, #tpu.memory_space<vmem>>, %arg3: memref<768x32xbf16, #tpu.memory_space<vmem>>, %arg4: memref<1x32xf32, #tpu.memory_space<vmem>>, %arg5: memref<128x32xbf16, #tpu.memory_space<vmem>>, %arg6: memref<4x128xf32, #tpu.memory_space<vmem>>, %arg7: memref<4x32xf32, #tpu.memory_space<vmem>>) attributes {dimension_semantics = [#tpu.dimension_semantics<parallel>, #tpu.dimension_semantics<arbitrary>], iteration_bounds = array<i64: 1, 1>, scalar_prefetch = 0 : i64, scratch_operands = 1 : i64, tpu.core_type = #tpu.core_type<tc>, window_params = [{transform_indices = @transform_0, window_bounds = array<i64: 4, 768>}, {transform_indices = @transform_1, window_bounds = array<i64: 768, 32>}, {pipeline_mode = #tpu.pipeline_mode<synchronous>, transform_indices = @transform_2, window_bounds = array<i64: 1, 32>}, {pipeline_mode = #tpu.pipeline_mode<synchronous>, transform_indices = @transform_3, window_bounds = array<i64: 128, 32>}, {transform_indices = @transform_4, window_bounds = array<i64: 4, 128>}]} {
    %c0_i32 = arith.constant 0 : i32
    %0 = arith.cmpi eq, %arg1, %c0_i32 : i32
    %1 = arith.extui %0 : i1 to i32
    %c0_i32_0 = arith.constant 0 : i32
    %2 = arith.cmpi ne, %1, %c0_i32_0 : i32
    scf.if %2 {
      %cst_10 = arith.constant 0.000000e+00 : f32
      %12 = vector.broadcast %cst_10 : f32 to vector<4x32xf32>
      %c0_11 = arith.constant 0 : index
      %c0_12 = arith.constant 0 : index
      %13 = vector.load %arg7[%c0_11, %c0_12] : memref<4x32xf32, #tpu.memory_space<vmem>>, vector<4x32xf32>
      tpu.vector_store %arg7[%c0_11, %c0_12], %12 {strides = array<i32>} : memref<4x32xf32, #tpu.memory_space<vmem>>, vector<4x32xf32>,
    } else {
    }
    %c0 = arith.constant 0 : index
    %c0_1 = arith.constant 0 : index
    %3 = vector.load %arg7[%c0, %c0_1] : memref<4x32xf32, #tpu.memory_space<vmem>>, vector<4x32xf32>
    %c0_2 = arith.constant 0 : index
    %c0_3 = arith.constant 0 : index
    %4 = vector.load %arg2[%c0_2, %c0_3] : memref<4x768xbf16, #tpu.memory_space<vmem>>, vector<4x768xbf16>
    %c0_4 = arith.constant 0 : index
    %c0_5 = arith.constant 0 : index
    %5 = vector.load %arg3[%c0_4, %c0_5] : memref<768x32xbf16, #tpu.memory_space<vmem>>, vector<768x32xbf16>
    %cst = arith.constant dense<0.000000e+00> : vector<4x32xf32>
    %6 = tpu.matmul %4, %5, %cst {dimension_numbers = #tpu.dot_dimension_numbers<[1], [0], [0], [1], [0, 0, 1, 1], [], []>} : vector<4x768xbf16>, vector<768x32xbf16>, vector<4x32xf32> -> vector<4x32xf32>
    %7 = arith.addf %3, %6 : vector<4x32xf32>
    %c0_6 = arith.constant 0 : index
    %c0_7 = arith.constant 0 : index
    %8 = vector.load %arg7[%c0_6, %c0_7] : memref<4x32xf32, #tpu.memory_space<vmem>>, vector<4x32xf32>
    tpu.vector_store %arg7[%c0_6, %c0_7], %7 {strides = array<i32>} : memref<4x32xf32, #tpu.memory_space<vmem>>, vector<4x32xf32>,
    %c0_i32_8 = arith.constant 0 : i32
    %9 = arith.cmpi eq, %arg1, %c0_i32_8 : i32
    %10 = arith.extui %9 : i1 to i32
    %c0_i32_9 = arith.constant 0 : i32
    %11 = arith.cmpi ne, %10, %c0_i32_9 : i32
    scf.if %11 {
      %c0_10 = arith.constant 0 : index
      %c0_11 = arith.constant 0 : index
      %12 = vector.load %arg7[%c0_10, %c0_11] : memref<4x32xf32, #tpu.memory_space<vmem>>, vector<4x32xf32>
      %c0_12 = arith.constant 0 : index
      %c0_13 = arith.constant 0 : index
      %13 = vector.load %arg4[%c0_12, %c0_13] : memref<1x32xf32, #tpu.memory_space<vmem>>, vector<1x32xf32>
      %14 = vector.broadcast %13 : vector<1x32xf32> to vector<4x32xf32>
      %15 = arith.addf %12, %14 : vector<4x32xf32>
      %16 = arith.mulf %15, %15 : vector<4x32xf32>
      %cst_14 = arith.constant dense<0.000000e+00> : vector<4xf32>
      %17 = vector.multi_reduction <add>, %16, %cst_14 [1] : vector<4x32xf32> to vector<4xf32>
      %18 = vector.shape_cast %17 : vector<4xf32> to vector<4x1xf32>
      %cst_15 = arith.constant 9.99999996E-13 : f32
      %19 = vector.broadcast %cst_15 : f32 to vector<4x1xf32>
      %20 = arith.addf %18, %19 : vector<4x1xf32>
      %21 = math.rsqrt %20 : vector<4x1xf32>
      %22 = vector.broadcast %21 : vector<4x1xf32> to vector<4x32xf32>
      %23 = arith.mulf %15, %22 : vector<4x32xf32>
      %24 = arith.truncf %23 : vector<4x32xf32> to vector<4x32xbf16>
      %c0_16 = arith.constant 0 : index
      %c0_17 = arith.constant 0 : index
      %25 = vector.load %arg5[%c0_16, %c0_17] : memref<128x32xbf16, #tpu.memory_space<vmem>>, vector<128x32xbf16>
      %cst_18 = arith.constant dense<0.000000e+00> : vector<4x128xf32>
      %26 = tpu.matmul %24, %25, %cst_18 {dimension_numbers = #tpu.dot_dimension_numbers<[1], [1], [0], [0], [0, 0, 1, 0], [], []>} : vector<4x32xbf16>, vector<128x32xbf16>, vector<4x128xf32> -> vector<4x128xf32>
      %cst_19 = arith.constant 1.000000e+02 : f32
      %27 = vector.broadcast %cst_19 : f32 to vector<4x128xf32>
      %28 = arith.mulf %27, %26 : vector<4x128xf32>
      %c0_20 = arith.constant 0 : index
      %c0_21 = arith.constant 0 : index
      %29 = vector.load %arg6[%c0_20, %c0_21] : memref<4x128xf32, #tpu.memory_space<vmem>>, vector<4x128xf32>
      tpu.vector_store %arg6[%c0_20, %c0_21], %28 {strides = array<i32>} : memref<4x128xf32, #tpu.memory_space<vmem>>, vector<4x128xf32>,
    } else {
    }
    return
  }
  func.func @transform_0(%arg0: i32, %arg1: i32) -> (i32, i32) {
    %c0_i32 = arith.constant 0 : i32
    return %arg0, %arg1 : i32, i32
  }
  func.func @transform_1(%arg0: i32, %arg1: i32) -> (i32, i32) {
    %c0_i32 = arith.constant 0 : i32
    %c0_i32_0 = arith.constant 0 : i32
    return %arg1, %c0_i32 : i32, i32
  }
  func.func @transform_2(%arg0: i32, %arg1: i32) -> (i32, i32) {
    %c0_i32 = arith.constant 0 : i32
    %c0_i32_0 = arith.constant 0 : i32
    %c0_i32_1 = arith.constant 0 : i32
    return %c0_i32, %c0_i32_0 : i32, i32
  }
  func.func @transform_3(%arg0: i32, %arg1: i32) -> (i32, i32) {
    %c0_i32 = arith.constant 0 : i32
    %c0_i32_0 = arith.constant 0 : i32
    %c0_i32_1 = arith.constant 0 : i32
    return %c0_i32, %c0_i32_0 : i32, i32
  }
  func.func @transform_4(%arg0: i32, %arg1: i32) -> (i32, i32) {
    %c0_i32 = arith.constant 0 : i32
    %c0_i32_0 = arith.constant 0 : i32
    return %arg0, %c0_i32 : i32, i32
  }
}

</mosaic_0001>

<bundles_post_ra>
// kernel: maskformer_clip_adapter_forward.2
= control target key start
LH: loop header
LB: loop body
LE: loop exit
PB: predicated region body
PF: predicated region fallthrough
CT: control target
= control target key end

     0   :  { %v30_v0 = vlaneseq  ;;  %vm21_vm0 = vcmask 1043456   ;;  %v170_v4 = vmov 0.0   ;;  %s229_s0 = inlined_call_operand.vmem [shape: f32[3,256], index: 0, kind: input, shape index: {}]   ;;  %s230_s1 = inlined_call_operand.vmem [shape: f32[4,256], index: 1, kind: input, shape index: {}]   ;;  %s231_s2 = inlined_call_operand.vmem [shape: f32[4,768], index: 2, kind: output, shape index: {0}]   ;;  %s232_s3 = inlined_call_operand.vmem [shape: bf16[4,768], index: 3, kind: output, shape index: {1}]   ;;  %s233_s4 = inlined_call_operand.vmem [shape: f32[4,128], index: 4, kind: output, shape index: {2}]  }
   0x1   :  { %v14_v1 = vld [vmem:[%s230_s1] sm:$0xff] }
   0x2   :  { %vm15_vm1 = vcmp.gt.f32.partialorder %v14_v1, 0.5  ;;  %v28_v2 = vld [vmem:[%s229_s0] ss:$4 sm:$0x3]  ;;  %v31_v3 = vshrl.u32 %v30_v0, 7 }
   0x3   :  { %v160_v5 = vsel %vm15_vm1, 1.0, %v170_v4  ;;  %v163_v6 = vld [vmem:[%s229_s0 + $0x1] ss:$4 sm:$0x3] }
   0x4   :  { %v19_v7 = vcombine.high %v160_v5, %v160_v5  ;;  %v22_v8 = vsel %vm21_vm0, %v160_v5, 0.0  ;;  %v32_v9 = vsub.s32 0, %v31_v3  ;;  %v36_v10 = vsub.s32 1, %v31_v3  ;;  %v166_v12 = vld [vmem:[%s229_s0 + $0x2] ss:$4 sm:$0x3] }
   0x5   :  { %v42_v11 = vsub.f32 1.0, %v160_v5 }
   0x6   :  { %v23_v13 = vsel %vm21_vm0, %v19_v7, 0.0  ;;  %v33_v14 = vrot.slane %v28_v2, %v32_v9  ;;  %v37_v15 = vrot.slane %v28_v2, %v36_v10  ;;  %v74_v16 = vrot.slane %v163_v6, %v32_v9 }
   0x7   :  { %v24_v17 = vadd.f32 %v23_v13, %v22_v8  ;;  %v43_v18 = vmul.f32 122.770935, %v42_v11  ;;  %v78_v19 = vrot.slane %v163_v6, %v36_v10  ;;  %v83_v20 = vmul.f32 116.74601, %v42_v11 }
   0x8   :  { %v40_v21 = vmul.f32 %v160_v5, %v33_v14  ;;  %v41_v22 = vmul.f32 %v37_v15, %v19_v7  ;;  %v81_v23 = vmul.f32 %v160_v5, %v74_v16  ;;  %v114_v24 = vrot.slane %v166_v12, %v32_v9 }
   0x9   :  { %25 = vadd.xlane.f32.xlu0 %v24_v17  ;;  %v45_v25 = vcombine.high %v43_v18, %v43_v18  ;;  %v82_v26 = vmul.f32 %v78_v19, %v19_v7  ;;  %v85_v27 = vcombine.high %v83_v20, %v83_v20  ;;  %v118_v28 = vrot.slane %v166_v12, %v36_v10 }
   0xa   :  { %v47_v29 = vadd.f32 %v43_v18, %v40_v21  ;;  %v87_v30 = vadd.f32 %v83_v20, %v81_v23  ;;  %v121_v31 = vmul.f32 %v160_v5, %v114_v24  ;;  %v123_v32 = vmul.f32 104.093735, %v42_v11 }
   0xb   :  { %v48_v33 = vadd.f32 %v45_v25, %v41_v22  ;;  %v88_v34 = vadd.f32 %v85_v27, %v82_v26  ;;  %v122_v35 = vmul.f32 %v118_v28, %v19_v7 }
   0xc   :  { %v125_v36 = vcombine.high %v123_v32, %v123_v32  ;;  %v127_v37 = vadd.f32 %v123_v32, %v121_v31 }
   0xd   :  { %v51_v38 = vcombine.low %v47_v29, %v48_v33  ;;  %v161_v39 = vpack.c.bf16 %v48_v33, %v47_v29  ;;  %v91_v40 = vcombine.low %v87_v30, %v88_v34  ;;  %v164_v41 = vpack.c.bf16 %v88_v34, %v87_v30 }
   0xe   :  { %v128_v42 = vadd.f32 %v125_v36, %v122_v35 }
   0xf   :  { %53 = vst [vmem:[%s231_s2] sm:$0xff] %v51_v38  ;;  %162 = vst.sshfl [vmem:[%s232_s3] sm:$0x33 pattern:$0x76325410] %v161_v39 }
  0x10   :  { %93 = vst [vmem:[%s231_s2 + $0x8] sm:$0xff] %v91_v40  ;;  %165 = vst.sshfl [vmem:[%s232_s3 + $0x4] sm:$0x33 pattern:$0x76325410] %v164_v41  ;;  %v131_v43 = vcombine.low %v127_v37, %v128_v42  ;;  %v167_v44 = vpack.c.bf16 %v128_v42, %v127_v37 }
  0x12   :  { %133 = vst [vmem:[%s231_s2 + $0x10] sm:$0xff] %v131_v43  ;;  %168 = vst.sshfl [vmem:[%s232_s3 + $0x8] sm:$0x33 pattern:$0x76325410] %v167_v44 }
  0x96   :  { %v26_v45 = vpop.xlane.xlu0 %25 }
  0x97   :  { %27 = vst [vmem:[%s233_s4] sm:$0xf] %v26_v45 }

// kernel: maskformer_clip_adapter_forward.3
= control target key start
LH: loop header
LB: loop body
LE: loop exit
PB: predicated region body
PF: predicated region fallthrough
CT: control target
= control target key end

     0   :  { %v130_v28 = vlaneseq  ;;  %v969_v36 = vmov 1983009808   ;;  %s1199_s0 = inlined_call_operand.vmem [shape: bf16[4,768], index: 0, kind: input, shape index: {}]   ;;  %s1200_s1 = inlined_call_operand.vmem [shape: bf16[768,32], index: 1, kind: input, shape index: {}]   ;;  %s1201_s2 = inlined_call_operand.vmem [shape: f32[1,32], index: 2, kind: input, shape index: {}]   ;;  %s1202_s3 = inlined_call_operand.vmem [shape: bf16[128,32], index: 3, kind: input, shape index: {}]   ;;  %s1203_s4 = inlined_call_operand.hbm [shape: f32[4,128], index: 4, kind: output, shape index: {}]  }
   0x1   :  { %v886_v0 = vld [vmem:[%s1200_s1 + $0x40] sm:$0xff]   ;;  %v890_v4 = vld [vmem:[%s1200_s1 + $0x48] sm:$0xff]   ;;  %v894_v8 = vld [vmem:[%s1200_s1 + $0x50] sm:$0xff]   ;;  %v128_v37 = vunpack.c.l.s4 %v969_v36 }
   0x2   :  { %v887_v1 = vld [vmem:[%s1200_s1 + $0xc0] sm:$0xff]   ;;  %787 = vmatprep.subr.bf16.mxu0 %v886_v0  ;;  %v891_v5 = vld [vmem:[%s1200_s1 + $0xc8] sm:$0xff]   ;;  %v895_v9 = vld [vmem:[%s1200_s1 + $0xd0] sm:$0xff]   ;;  %v131_v33 = vshrl.u32 %v130_v28, 7 }
   0x3   :  { %v888_v2 = vld [vmem:[%s1200_s1] sm:$0xff]   ;;  %809 = vmatprep.subr.bf16.mxu1 %v887_v1  ;;  %v892_v6 = vld [vmem:[%s1200_s1 + $0x8] sm:$0xff]   ;;  %v896_v10 = vld [vmem:[%s1200_s1 + $0x10] sm:$0xff]   ;;  %v129_v38 = vunpack.c.0.s8 %v128_v37 }
   0x4   :  { %v889_v3 = vld [vmem:[%s1200_s1 + $0x80] sm:$0xff]   ;;  %788 = vmatpush3.bf16.msra.mxu0 %v888_v2  ;;  %v893_v7 = vld [vmem:[%s1200_s1 + $0x88] sm:$0xff]   ;;  %v897_v11 = vld [vmem:[%s1200_s1 + $0x90] sm:$0xff]  }
   0x5   :  { %810 = vmatpush3.bf16.msra.mxu1 %v889_v3  ;;  %789 = vmatprep.subr.bf16.mxu0 %v890_v4  ;;  %v898_v12 = vld [vmem:[%s1200_s1 + $0x58] sm:$0xff]   ;;  %v902_v16 = vld [vmem:[%s1200_s1 + $0x60] sm:$0xff]   ;;  %v906_v20 = vld [vmem:[%s1200_s1 + $0x68] sm:$0xff]   ;;  %v132_v40 = vsub.s32 %v129_v38, %v131_v33 }
   0x6   :  { %811 = vmatprep.subr.bf16.mxu1 %v891_v5  ;;  %v899_v13 = vld [vmem:[%s1200_s1 + $0xd8] sm:$0xff]   ;;  %v903_v17 = vld [vmem:[%s1200_s1 + $0xe0] sm:$0xff]   ;;  %v907_v21 = vld [vmem:[%s1200_s1 + $0xe8] sm:$0xff]  }
   0x7   :  { %v900_v14 = vld [vmem:[%s1200_s1 + $0x18] sm:$0xff]   ;;  %v904_v18 = vld [vmem:[%s1200_s1 + $0x20] sm:$0xff]   ;;  %v908_v22 = vld [vmem:[%s1200_s1 + $0x28] sm:$0xff]  }
   0x8   :  { %790 = vmatpush3.bf16.msra.mxu0 %v892_v6  ;;  %v901_v15 = vld [vmem:[%s1200_s1 + $0x98] sm:$0xff]   ;;  %v905_v19 = vld [vmem:[%s1200_s1 + $0xa0] sm:$0xff]   ;;  %v909_v23 = vld [vmem:[%s1200_s1 + $0xa8] sm:$0xff]  }
   0x9   :  { %812 = vmatpush3.bf16.msra.mxu1 %v893_v7  ;;  %791 = vmatprep.subr.bf16.mxu0 %v894_v8  ;;  %v910_v24 = vld [vmem:[%s1200_s1 + $0x70] sm:$0xff]   ;;  %v914_v29 = vld [vmem:[%s1200_s1 + $0x78] sm:$0xff]   ;;  %v26_v34 = vld [vmem:[%s1199_s0] sm:$0xff] }
   0xa   :  { %813 = vmatprep.subr.bf16.mxu1 %v895_v9  ;;  %v911_v25 = vld [vmem:[%s1200_s1 + $0xf0] sm:$0xff]   ;;  %v915_v30 = vld [vmem:[%s1200_s1 + $0xf8] sm:$0xff]   ;;  %v919_v35 = vld [vmem:[%s1200_s1 + $0x140] sm:$0xff]   ;;  %v126_v39 = vcombine.high %v26_v34, %v26_v34  ;;  %v133_v41 = vrot.slane %v26_v34, %v132_v40 }
   0xb   :  { %v912_v26 = vld [vmem:[%s1200_s1 + $0x30] sm:$0xff]   ;;  %v916_v31 = vld [vmem:[%s1200_s1 + $0x38] sm:$0xff]   ;;  %v920_v45 = vld [vmem:[%s1200_s1 + $0x100] sm:$0xff]  }
   0xc   :  { %792 = vmatpush3.bf16.msra.mxu0 %v896_v10  ;;  %v913_v27 = vld [vmem:[%s1200_s1 + $0xb0] sm:$0xff]   ;;  %v917_v32 = vld [vmem:[%s1200_s1 + $0xb8] sm:$0xff]   ;;  %v140_v42 = vrot.slane %v126_v39, %v132_v40  ;;  %v141_v43 = vcombine.high %v133_v41, %v133_v41  ;;  %v921_v46 = vld [vmem:[%s1200_s1 + $0x148] sm:$0xff]  }
   0xd   :  { %814 = vmatpush3.bf16.msra.mxu1 %v897_v11  ;;  %793 = vmatprep.subr.bf16.mxu0 %v898_v12  ;;  %v922_v47 = vld [vmem:[%s1200_s1 + $0x108] sm:$0xff]   ;;  %v923_v48 = vld [vmem:[%s1200_s1 + $0x150] sm:$0xff]   ;;  %v925_v50 = vld [vmem:[%s1200_s1 + $0x158] sm:$0xff]  }
   0xe   :  { %815 = vmatprep.subr.bf16.mxu1 %v899_v13  ;;  %v142_v44 = vcombine.high %v140_v42, %v140_v42  ;;  %477 = vmatprep.mubr.bf16.mxu0 %v141_v43  ;;  %v924_v49 = vld [vmem:[%s1200_s1 + $0x110] sm:$0xff]   ;;  %v728_v51 = vld.sshfl [vmem:[%s1199_s0 + $0x8] sm:$0x33 pattern:$0x76325410]  ;;  %v926_v53 = vld [vmem:[%s1200_s1 + $0x118] sm:$0xff]  }
   0xf   :  { %v150_v52 = vcombine.high %v728_v51, %v728_v51  ;;  %v927_v54 = vld [vmem:[%s1200_s1 + $0x160] sm:$0xff]  }
  0x10   :  { %794 = vmatpush3.bf16.msra.mxu0 %v900_v14  ;;  %517 = vmatprep.mubr.bf16.mxu1 %v142_v44 }
  0x11   :  { %816 = vmatpush3.bf16.msra.mxu1 %v901_v15  ;;  %795 = vmatprep.subr.bf16.mxu0 %v902_v16 }
  0x12   :  { %817 = vmatprep.subr.bf16.mxu1 %v903_v17 }
  0x14   :  { %796 = vmatpush3.bf16.msra.mxu0 %v904_v18 }
  0x15   :  { %818 = vmatpush3.bf16.msra.mxu1 %v905_v19  ;;  %797 = vmatprep.subr.bf16.mxu0 %v906_v20 }
  0x16   :  { %819 = vmatprep.subr.bf16.mxu1 %v907_v21 }
  0x18   :  { %798 = vmatpush3.bf16.msra.mxu0 %v908_v22 }
  0x19   :  { %820 = vmatpush3.bf16.msra.mxu1 %v909_v23  ;;  %799 = vmatprep.subr.bf16.mxu0 %v910_v24 }
  0x1a   :  { %821 = vmatprep.subr.bf16.mxu1 %v911_v25 }
  0x1c   :  { %800 = vmatpush3.bf16.msra.mxu0 %v912_v26 }
  0x1d   :  { %822 = vmatpush3.bf16.msra.mxu1 %v913_v27  ;;  %801 = vmatprep.subr.bf16.mxu0 %v914_v29 }
  0x1e   :  { %823 = vmatprep.subr.bf16.mxu1 %v915_v30 }
  0x20   :  { %802 = vmatpush3.bf16.msra.mxu0 %v916_v31 }
  0x21   :  { %824 = vmatpush3.bf16.msra.mxu1 %v917_v32  ;;  %831 = vmatprep.subr.bf16.mxu0 %v919_v35 }
  0x23   :  { %478 = vmatmul.mubr.bf16.vlgmr.msra.gmra.mrb[0].mxu0 %v133_v41 }
  0x24   :  { %518 = vmatmul.mubr.bf16.vlgmr.msra.gmra.mrb[0].mxu1 %v140_v42  ;;  %832 = vmatpush3.bf16.msra.mxu0 %v920_v45 }
  0x25   :  { %833 = vmatprep.subr.bf16.mxu0 %v921_v46  ;;  %557 = vmatprep.mubr.bf16.mxu0 %v150_v52 }
  0x28   :  { %834 = vmatpush3.bf16.msra.mxu0 %v922_v47 }
  0x29   :  { %835 = vmatprep.subr.bf16.mxu0 %v923_v48 }
  0x2c   :  { %836 = vmatpush3.bf16.msra.mxu0 %v924_v49 }
  0x2d   :  { %837 = vmatprep.subr.bf16.mxu0 %v925_v50 }
  0x2e   :  { %9 = vsyncpa [#allocation4], 0  ;;  %v928_v55 = vld [vmem:[%s1200_s1 + $0x120] sm:$0xff]   ;;  %v929_v56 = vld [vmem:[%s1200_s1 + $0x168] sm:$0xff]   ;;  %vm23_vm0 = vcmask 257024   ;;  %v970_v62 = vmov 0.0  }
  0x2f   :  { %v930_v57 = vld [vmem:[%s1200_s1 + $0x128] sm:$0xff]   ;;  %v931_v58 = vld [vmem:[%s1200_s1 + $0x170] sm:$0xff]   ;;  %v933_v60 = vld [vmem:[%s1200_s1 + $0x178] sm:$0xff]   ;;  %24 = vst.msk [vmem:[#allocation2] sm:$0xf] %vm23_vm0, %v970_v62  ;;  %862 = vmatprep.subr.bf16.mxu1 %v970_v62  ;;  %vm644_vm1 = vcmask 261120  }
  0x30   :  { %838 = vmatpush3.bf16.msra.mxu0 %v926_v53  ;;  %v932_v59 = vld [vmem:[%s1200_s1 + $0x130] sm:$0xff]   ;;  %v934_v61 = vld [vmem:[%s1200_s1 + $0x138] sm:$0xff]   ;;  %v935_v63 = vld [vmem:[%s1202_s3] sm:$0xff]   ;;  %vm971_vm2 = vmmov 0  }
  0x31   :  { %839 = vmatprep.subr.bf16.mxu0 %v927_v54  ;;  %v649_v0 = vsel %vm644_vm1, %v935_v63, 0  ;;  %v936_v1 = vld [vmem:[%s1202_s3 + $0x8] sm:$0xff]   ;;  %v937_v3 = vld [vmem:[%s1202_s3 + $0x10] sm:$0xff]   ;;  %v938_v5 = vld [vmem:[%s1202_s3 + $0x18] sm:$0xff]   ;;  %878 = vmatprep.mubr.msk.bf16.mxu1 %vm971_vm2, %v970_v62 }
  0x32   :  { %863 = vmatpush3.bf16.xpose.msra.mxu1 %v649_v0  ;;  %v652_v2 = vsel %vm644_vm1, %v936_v1, 0  ;;  %v655_v4 = vsel %vm644_vm1, %v937_v3, 0  ;;  %v658_v6 = vsel %vm644_vm1, %v938_v5, 0  ;;  %v939_v7 = vld [vmem:[%s1202_s3 + $0x20] sm:$0xff]   ;;  %v940_v9 = vld [vmem:[%s1202_s3 + $0x28] sm:$0xff]   ;;  %v941_v35 = vld [vmem:[%s1202_s3 + $0x30] sm:$0xff]  }
  0x33   :  { %864 = vmatprep.subr.bf16.mxu1 %v970_v62  ;;  %v661_v8 = vsel %vm644_vm1, %v939_v7, 0  ;;  %v664_v10 = vsel %vm644_vm1, %v940_v9, 0  ;;  %v777_v30 = vld [vmem:[%s1201_s2] ss:$0 sm:$0xff]  ;;  %v667_v36 = vsel %vm644_vm1, %v941_v35, 0  ;;  %v942_v37 = vld [vmem:[%s1202_s3 + $0x38] sm:$0xff]  }
  0x34   :  { %840 = vmatpush3.bf16.msra.mxu0 %v928_v55  ;;  %v670_v38 = vsel %vm644_vm1, %v942_v37, 0  ;;  %s972_s2 = smov [#allocation3]  }
  0x35   :  { %841 = vmatprep.subr.bf16.mxu0 %v929_v56  ;;  %s720_s26 = sshll.u32 %s972_s2, 4  ;;  %s721_s26 = int_to_ptr.vmem [resolvable:$true] %s720_s26 }
  0x36   :  { %v25_v27 = vld [vmem:[#allocation2] sm:$0xf]  ;;  %s945_s3 = scalar_lea.vmem %s721_s26, 64  ;;  %p950_p1 = scmp.lt.s32.totalorder %s721_s26, %s721_s26 }
  0x37   :  { %p946_p0 = scmp.ne.s32.totalorder %s721_s26, %s945_s3  ;;  %p951_p2 = scmp.lt.s32.totalorder %s945_s3, %s945_s3 }
  0x38   :  { %842 = vmatpush3.bf16.msra.mxu0 %v930_v57 }
  0x39   :  { %843 = vmatprep.subr.bf16.mxu0 %v931_v58  ;;  %p952_p3 = por %p951_p2, %p950_p1 }
  0x3a   :  { %865 = vmatpush3.bf16.xpose.msra.mxu1 %v652_v2 }
  0x3b   :  { %866 = vmatprep.subr.bf16.mxu1 %v970_v62  ;;  %p953_p4 = pnand %p952_p3, %p946_p0 }
  0x3c   :  { %844 = vmatpush3.bf16.msra.mxu0 %v932_v59 }
  0x3d   :  { %845 = vmatprep.subr.bf16.mxu0 %v933_v60 }
  0x40   :  { %846 = vmatpush3.bf16.msra.mxu0 %v934_v61 }
  0x42   :  { %867 = vmatpush3.bf16.xpose.msra.mxu1 %v655_v4 }
  0x43   :  { %558 = vmatmul.mubr.bf16.vlgmr.msra.gmra.mrb[4].mxu0 %v728_v51  ;;  %868 = vmatprep.subr.bf16.mxu1 %v970_v62 }
  0x4a   :  { %869 = vmatpush3.bf16.xpose.msra.mxu1 %v658_v6 }
  0x4b   :  { %870 = vmatprep.subr.bf16.mxu1 %v970_v62 }
  0x52   :  { %871 = vmatpush3.bf16.xpose.msra.mxu1 %v661_v8 }
  0x53   :  { %872 = vmatprep.subr.bf16.mxu1 %v970_v62 }
  0x5a   :  { %873 = vmatpush3.bf16.xpose.msra.mxu1 %v664_v10 }
  0x5b   :  { %874 = vmatprep.subr.bf16.mxu1 %v970_v62 }
  0x62   :  { %875 = vmatpush3.bf16.xpose.msra.mxu1 %v667_v36 }
  0x63   :  { %876 = vmatprep.subr.bf16.mxu1 %v970_v62 }
  0x6a   :  { %877 = vmatpush3.bf16.xpose.msra.mxu1 %v670_v38 }
  0xf6   :  { %v803_v11 = vpop.f32.mrb[0].mxu0 }
  0xf7   :  { %v825_v12 = vpop.f32.mrb[0].mxu1  ;;  %v804_v13 = vpop.f32.mrb[1].mxu0 }
  0xf8   :  { %v826_v14 = vpop.f32.mrb[1].mxu1  ;;  %v805_v15 = vadd.f32 %v804_v13, %v803_v11  ;;  %v806_v17 = vpop.f32.mrb[2].mxu0 }
  0xf9   :  { %v827_v16 = vadd.f32 %v826_v14, %v825_v12  ;;  %v828_v18 = vpop.f32.mrb[2].mxu1  ;;  %v807_v19 = vpop.f32.mrb[3].mxu0 }
  0xfa   :  { %v829_v20 = vpop.f32.mrb[3].mxu1 }
  0xfb   :  { %v520_v21 = vadd.f32 %v827_v16, %v805_v15 }
 0x116   :  { %v847_v22 = vpop.f32.mrb[4].mxu0 }
 0x117   :  { %v848_v23 = vpop.f32.mrb[5].mxu0 }
 0x118   :  { %v849_v24 = vadd.f32 %v848_v23, %v847_v22  ;;  %v850_v25 = vpop.f32.mrb[6].mxu0 }
 0x119   :  { %v851_v26 = vpop.f32.mrb[7].mxu0 }
 0x11a   :  { %v560_v28 = vadd.f32 %v849_v24, %v520_v21 }
 0x11c   :  { %v565_v29 = vadd.f32 %v560_v28, %v25_v27 }
 0x11e   :  { %567 = vst.msk [vmem:[#allocation2] sm:$0xf] %vm23_vm0, %v565_v29 }
 0x125   :  { %v571_v31 = vld [vmem:[#allocation2] sm:$0xf] }
 0x126   :  { %v579_v32 = vadd.f32 %v777_v30, %v571_v31 }
 0x128   :  { %v580_v33 = vmul.f32 %v579_v32, %v579_v32 }
 0x12a   :  { %v581_v34 = vsel %vm23_vm0, %v580_v33, 0.0 }
 0x12b   :  { %582 = vadd.xlane.f32.xlu0 %v581_v34 }
 0x1b8   :  { %v583_v39 = vpop.xlane.xlu0 %582 }
 0x1b9   :  { %v584_v40 = vadd.f32 1e-12, %v583_v39 }
 0x1bb   :  { %943 = vrsqrt.f32 %v584_v40 }
 0x1c5   :  { %v944_v41 = vpop.eup %943 }
 0x1c6   :  { %v586_v42 = vmul.f32 %v944_v41, %v579_v32 }
 0x1c8   :  { %v587_v43 = vpack.c.bf16 %v586_v42, %v586_v42 }
 0x1ca   :  { %879 = vmatmul.mubr.msk.bf16.vlgmr.msra.gmra.mrb[4].mxu1 %vm644_vm1, %v587_v43 }
 0x29d   :  { %v706_v44 = vpop.f32.mrb[4].mxu1 }
 0x29e   :  { %v712_v45 = vmul.f32 100.0, %v706_v44  ;;  %v880_v46 = vpop.f32.mrb[5].mxu1 }
 0x29f   :  { %v709_v47 = vpop.f32.mrb[6].mxu1 }
 0x2a0   :  { %713 = vst [vmem:[#allocation3] sm:$0xf] %v712_v45  ;;  %v881_v48 = vpop.f32.mrb[7].mxu1 }
 0x2a1   :  { %956 = shalt.err (!%p953_p4)
}
 0x2a2   :  { %s957_s29 = scalar_lea.hbm %s1203_s4, 64 }
 0x2a3   :  { %p958_p5 = scmp.ne.s32.totalorder %s1203_s4, %s957_s29  ;;  %p961_p6 = scmp.lt.u32.totalorder %s957_s29, %s1203_s4 }
 0x2a5   :  { %p963_p7 = pnand %p961_p6, %p958_p5 }
 0x2a7   :  { %966 = shalt.err (!%p963_p7)
}
 0x2a8   :  { %723 = dma.vmem_to_hbm [thread:$0]  %s721_s26, 64, %s1203_s4, [#allocation4]  }
 0x2a9   :  { %967 = dma.done.wait [#allocation4], 64  }
 0x2aa   :  { %968 = vsyncadd [#allocation4], 4294967232 }
 0x2ab   :  { %727 = vsyncpa [#allocation4], 1 }

</bundles_post_ra>
